<compile_context>
chip_gen: v5e
topology: v5e:2x2
jax: 0.10.0
libtpu: 0.0.40
codegen_flags: <defaults>
</compile_context>

<pallas_src>
import functools

import jax
import jax.numpy as jnp
from jax.experimental import pallas as pl
from jax.experimental.pallas import tpu as pltpu


# ----------------------------------------------------------------------------
# helpers
# ----------------------------------------------------------------------------
def _round_up(n, m):
    return ((n + m - 1) // m) * m


def _vmem_tile_bytes(rows, cols, itemsize=4):
    """VMEM footprint of a 2-D f32 buffer under (8, 128) tiling."""
    return _round_up(max(rows, 1), 8) * _round_up(max(cols, 1), 128) * itemsize


def _vmem_limit_bytes(rows_per_step, n_samp, c, h1, h2, out_ch):
    """Right-sized VMEM budget: double-buffered blocks + intermediates + slack.

    Clamped to [16 MiB, 64 MiB]: 16 MiB is v5e's default scope (never shrink
    below it), 64 MiB is v7x's physical VMEM per TensorCore (v5e/v6e have 128).
    """
    dbl = 2 * (_vmem_tile_bytes(rows_per_step, c)             # x tile
               + _vmem_tile_bytes(n_samp, out_ch)             # out tile
               + _vmem_tile_bytes(c, h1) + _vmem_tile_bytes(1, h1)
               + _vmem_tile_bytes(h1, h2) + _vmem_tile_bytes(1, h2)
               + _vmem_tile_bytes(h2, out_ch) + _vmem_tile_bytes(1, out_ch)
               + _vmem_tile_bytes(n_samp, rows_per_step))     # pooling matrix
    interm = (_vmem_tile_bytes(rows_per_step, h1)
              + _vmem_tile_bytes(rows_per_step, h2)
              + _vmem_tile_bytes(rows_per_step, out_ch))
    limit = int((dbl + interm) * 1.5) + (4 << 20)
    return min(max(limit, 16 << 20), 64 << 20)


def _multi_tensorcore_chip():
    """True on chips whose TensorCores share a pallas grid under "parallel"
    semantics (v7x: 2 TCs/chip, v4/v5p megacore).  v5e/v6e are single-TC, so
    splitting a single tile there is pure overhead.  Conservative: defaults
    to False if the device kind cannot be determined."""
    try:
        kind = jax.devices()[0].device_kind.lower()
    except Exception:
        return False
    return any(tag in kind for tag in ("v7", "v4", "v5p"))


def _pick_sample_tile(n_samples, block_samples):
    """Sample-tile size (rows per grid step = tile * T).

    8-aligned (f32 sublane tile).  If the whole batch fits in one tile, keep
    it whole on single-TC chips and split into two equal 8-aligned tiles on
    multi-TC chips so both cores get balanced work."""
    if n_samples <= block_samples:
        if (_multi_tensorcore_chip() and n_samples >= 64
                and n_samples % 16 == 0):
            return n_samples // 2          # two equal tiles, one per TC
        return n_samples                   # full-array block: always legal
    return max(8, (min(block_samples, n_samples) // 8) * 8)


# ----------------------------------------------------------------------------
# fused Regressor_delta MLP + mean-over-tokens kernel
# ----------------------------------------------------------------------------
def _mlp_mean_kernel(x_ref, w1_ref, b1_ref, w2_ref, b2_ref, w3_ref, b3_ref,
                     avg_ref, o_ref, *, rows_per_step, total_rows, inv_t,
                     mask_rows):
    """One tile of n_samp samples (= rows_per_step = n_samp*T token rows).

    All matmuls run on the MXU with f32 operands and f32 accumulation; bias
    add + ReLU ride the VPU; the per-sample mean over T tokens is a tiny
    second MXU matmul against a constant {0,1} token->sample pooling matrix.
    """
    x = x_ref[...]                                                  # (R, C) f32

    # layer 1 + ReLU
    h = jnp.dot(x, w1_ref[...], preferred_element_type=jnp.float32) + b1_ref[...]
    h = jnp.maximum(h, 0.0)
    # layer 2 + ReLU
    h = jnp.dot(h, w2_ref[...], preferred_element_type=jnp.float32) + b2_ref[...]
    h = jnp.maximum(h, 0.0)
    # layer 3: per-token delta
    d = jnp.dot(h, w3_ref[...], preferred_element_type=jnp.float32) + b3_ref[...]

    if mask_rows:
        # The last tile may read past the end of x (those rows are undefined);
        # zero their per-token deltas so they cannot pollute real samples via
        # the pooling matmul below (real-sample output rows are exact; the
        # out-of-range output rows are masked on writeback by Pallas).
        row0 = pl.program_id(0) * rows_per_step
        rows = row0 + jax.lax.broadcasted_iota(jnp.int32, d.shape, 0)
        d = jnp.where(rows < total_rows, d, 0.0)

    # mean over the T tokens of each sample:  (n_samp, R) @ (R, out) * 1/T
    pooled = jnp.dot(avg_ref[...], d, preferred_element_type=jnp.float32)
    o_ref[...] = (pooled * inv_t).astype(o_ref.dtype)


@functools.partial(jax.jit, static_argnames=("block_samples",))
def regressor_delta_mean(feats, w1, b1, w2, b2, w3, b3, *, block_samples=256):
    """Fused Regressor_delta + mean over temporal tokens.

    feats : (N, T, C) f32 decoder feature map (N = 2*batch for the 12/21 pair)
    w_i   : (in_i, out_i) pre-transposed nn.Linear weights, b_i : (1, out_i)
    Returns (N, out_ch) f32  ==  Regressor_delta(feats).mean(axis=1)
    """
    N, T, C = feats.shape
    H1, H2, out_ch = w1.shape[1], w2.shape[1], w3.shape[1]
    total_rows = N * T

    # ---- tile selection ------------------------------------------------
    n_samp = _pick_sample_tile(N, block_samples)
    rows_per_step = n_samp * T
    grid = (pl.cdiv(N, n_samp),)
    mask_rows = (total_rows % rows_per_step) != 0

    # token -> sample pooling matrix for one tile (entries in {0,1}; the 1/T
    # scale is applied after the matmul so the in-kernel sum stays exact).
    samp = jax.lax.broadcasted_iota(jnp.int32, (n_samp, rows_per_step), 0)
    row = jax.lax.broadcasted_iota(jnp.int32, (n_samp, rows_per_step), 1)
    avg = (row // T == samp).astype(jnp.float32)

    # Leading-dim collapse is free (no data movement), unlike the old
    # pad+cast pass over x.
    x_flat = feats.reshape(total_rows, C)

    kernel = functools.partial(
        _mlp_mean_kernel, rows_per_step=rows_per_step, total_rows=total_rows,
        inv_t=1.0 / T, mask_rows=mask_rows)

    vmem_limit = _vmem_limit_bytes(rows_per_step, n_samp, C, H1, H2, out_ch)
    flops = (2 * total_rows * (C * H1 + H1 * H2 + H2 * out_ch)
             + 2 * grid[0] * n_samp * rows_per_step * out_ch)
    bytes_accessed = 4 * (total_rows * C + C * H1 + H1 * H2 + H2 * out_ch
                          + H1 + H2 + out_ch + n_samp * rows_per_step
                          + N * out_ch)

    # Constant-index blocks: the weights / biases / pooling matrix see the
    # same block every grid step, so they stay resident in VMEM (their total
    # footprint is far below the limit, so the default double buffer is kept).
    const = lambda shape: pl.BlockSpec(shape, lambda i: (0, 0))

    out = pl.pallas_call(
        kernel,
        out_shape=jax.ShapeDtypeStruct((N, out_ch), jnp.float32),
        grid_spec=pltpu.PrefetchScalarGridSpec(
            num_scalar_prefetch=0,
            grid=grid,
            in_specs=[
                pl.BlockSpec((rows_per_step, C), lambda i: (i, 0)),   # x tile
                const((C, H1)), const((1, H1)),                       # layer 1
                const((H1, H2)), const((1, H2)),                      # layer 2
                const((H2, out_ch)), const((1, out_ch)),              # layer 3
                const((n_samp, rows_per_step)),                       # pooling
            ],
            out_specs=pl.BlockSpec((n_samp, out_ch), lambda i: (i, 0)),
        ),
        compiler_params=pltpu.CompilerParams(
            dimension_semantics=("parallel",),
            vmem_limit_bytes=vmem_limit,
        ),
        cost_estimate=pl.CostEstimate(
            flops=int(flops), transcendentals=0,
            bytes_accessed=int(bytes_accessed)),
    )(x_flat, w1, b1, w2, b2, w3, b3, avg)
    return out


# ----------------------------------------------------------------------------
# BaseModel forward glue (relative score + AQA MSE loss)
# ----------------------------------------------------------------------------
def base_model_forward(decoder_12_21, label_1_score, label_2_score, params,
                       weight_loss_aqa=1.0):
    """Mirrors BaseModel.forward after the Decoder_vit stage."""
    w1, b1, w2, b2, w3, b3 = params
    delta = regressor_delta_mean(decoder_12_21, w1, b1, w2, b2, w3, b3)  # (2B, out)
    # Like the original `delta.mean(1).squeeze()`, this assumes out_ch == 1.
    delta = jnp.squeeze(delta)                                           # (2B,)
    half = delta.shape[0] // 2
    score = jax.lax.stop_gradient(delta[:half]) + label_2_score

    mse = lambda a, b: jnp.mean((a - b) ** 2)
    loss_aqa = (mse(delta[:half], label_1_score - label_2_score)
                + mse(delta[half:], label_2_score - label_1_score))
    loss = loss_aqa * weight_loss_aqa
    losses = {"loss": loss,
              f"aqa_loss*[{weight_loss_aqa}]": loss_aqa * weight_loss_aqa}
    return score, losses


# ----------------------------------------------------------------------------
# parameter init (nn.Linear-compatible, weights pre-transposed to (in, out))
# ----------------------------------------------------------------------------
def init_mlp_params(key, in_channel, out_channel, dtype=jnp.float32):
    dims = [(in_channel, 256), (256, 64), (64, out_channel)]
    params = []
    for fan_in, fan_out in dims:
        key, kw, kb = jax.random.split(key, 3)
        bound = 1.0 / jnp.sqrt(fan_in)
        w = jax.random.uniform(kw, (fan_in, fan_out), dtype, -bound, bound)
        b = jax.random.uniform(kb, (1, fan_out), dtype, -bound, bound)
        params.extend([w, b])
    return params


if __name__ == "__main__":
    # Shapes consistent with the module: B=2 paired videos, T=10 temporal
    # tokens (len(start_idx)), decoder feature dim C=32, regressor out_ch=1.
    B, T, C, OUT_CH = 2, 10, 32, 1

    key = jax.random.PRNGKey(0)
    key, kf, k1, k2 = jax.random.split(key, 4)
    decoder_12_21 = jax.random.normal(kf, (2 * B, T, C), jnp.float32)
    label_1_score = jax.random.uniform(k1, (B,), jnp.float32)
    label_2_score = jax.random.uniform(k2, (B,), jnp.float32)

    params = init_mlp_params(key, C, OUT_CH)
    w1, b1, w2, b2, w3, b3 = params

    # --- Pallas path ---------------------------------------------------------
    delta_mean = regressor_delta_mean(decoder_12_21, *params)         # (2B, 1)
    score, losses = base_model_forward(decoder_12_21, label_1_score,
                                       label_2_score, params,
                                       weight_loss_aqa=1.0)
    score = jax.block_until_ready(score)

    # --- pure-JAX f32 reference ----------------------------------------------
    hi = jax.lax.Precision.HIGHEST

    def ref_mlp(z):
        z = jnp.maximum(jnp.dot(z, w1, precision=hi) + b1, 0.0)
        z = jnp.maximum(jnp.dot(z, w2, precision=hi) + b2, 0.0)
        return jnp.dot(z, w3, precision=hi) + b3

    flat = decoder_12_21.reshape(-1, C)
    ref_delta_rows = ref_mlp(flat).reshape(2 * B, T, OUT_CH)
    ref_delta = jnp.squeeze(ref_delta_rows.mean(axis=1))
    ref_score = ref_delta[:B] + label_2_score
    mse = lambda a, b: jnp.mean((a - b) ** 2)
    ref_loss = (mse(ref_delta[:B], label_1_score - label_2_score)
                + mse(ref_delta[B:], label_2_score - label_1_score))

    assert delta_mean.shape == (2 * B, OUT_CH)
    assert score.shape == (B,)
    # f32 matmuls in-kernel -> tight agreement with the f32 reference.
    assert jnp.allclose(jnp.squeeze(delta_mean), ref_delta, atol=5e-3, rtol=5e-3)
    assert jnp.allclose(score, ref_score, atol=5e-3, rtol=5e-3)
    assert jnp.allclose(losses["loss"], ref_loss, atol=5e-3, rtol=5e-3)

    # --- also exercise the multi-tile + partial-last-tile (masked) path -------
    N2 = 40
    key, kx = jax.random.split(key)
    feats2 = jax.random.normal(kx, (N2, T, C), jnp.float32)
    out2 = regressor_delta_mean(feats2, *params, block_samples=16)  # grid=3, runt tile
    out2 = jax.block_until_ready(out2)
    ref2 = ref_mlp(feats2.reshape(-1, C)).reshape(N2, T, OUT_CH).mean(axis=1)
    assert out2.shape == (N2, OUT_CH)
    assert jnp.allclose(out2, ref2, atol=5e-3, rtol=5e-3)

    print("KERNEL_OK")
</pallas_src>

<mosaic_0001>
module attributes {stable_mosaic.version = 11 : i64} {
  func.func @_mlp_mean_kernel(%arg0: i32, %arg1: memref<40x32xf32, #tpu.memory_space<vmem>>, %arg2: memref<32x256xf32, #tpu.memory_space<vmem>>, %arg3: memref<1x256xf32, #tpu.memory_space<vmem>>, %arg4: memref<256x64xf32, #tpu.memory_space<vmem>>, %arg5: memref<1x64xf32, #tpu.memory_space<vmem>>, %arg6: memref<64x1xf32, #tpu.memory_space<vmem>>, %arg7: memref<1x1xf32, #tpu.memory_space<vmem>>, %arg8: memref<4x40xf32, #tpu.memory_space<vmem>>, %arg9: memref<4x1xf32, #tpu.memory_space<vmem>>) attributes {dimension_semantics = [#tpu.dimension_semantics<parallel>], iteration_bounds = array<i64: 1>, scalar_prefetch = 0 : i64, scratch_operands = 0 : i64, tpu.core_type = #tpu.core_type<tc>, window_params = [{transform_indices = @transform_0, window_bounds = array<i64: 40, 32>}, {pipeline_mode = #tpu.pipeline_mode<synchronous>, transform_indices = @transform_1, window_bounds = array<i64: 32, 256>}, {pipeline_mode = #tpu.pipeline_mode<synchronous>, transform_indices = @transform_2, window_bounds = array<i64: 1, 256>}, {pipeline_mode = #tpu.pipeline_mode<synchronous>, transform_indices = @transform_3, window_bounds = array<i64: 256, 64>}, {pipeline_mode = #tpu.pipeline_mode<synchronous>, transform_indices = @transform_4, window_bounds = array<i64: 1, 64>}, {pipeline_mode = #tpu.pipeline_mode<synchronous>, transform_indices = @transform_5, window_bounds = array<i64: 64, 1>}, {pipeline_mode = #tpu.pipeline_mode<synchronous>, transform_indices = @transform_6, window_bounds = array<i64: 1, 1>}, {pipeline_mode = #tpu.pipeline_mode<synchronous>, transform_indices = @transform_7, window_bounds = array<i64: 4, 40>}, {transform_indices = @transform_8, window_bounds = array<i64: 4, 1>}]} {
    %c0 = arith.constant 0 : index
    %c0_0 = arith.constant 0 : index
    %0 = vector.load %arg1[%c0, %c0_0] : memref<40x32xf32, #tpu.memory_space<vmem>>, vector<40x32xf32>
    %c0_1 = arith.constant 0 : index
    %c0_2 = arith.constant 0 : index
    %1 = vector.load %arg2[%c0_1, %c0_2] : memref<32x256xf32, #tpu.memory_space<vmem>>, vector<32x256xf32>
    %cst = arith.constant dense<0.000000e+00> : vector<40x256xf32>
    %2 = tpu.matmul %0, %1, %cst {dimension_numbers = #tpu.dot_dimension_numbers<[1], [0], [0], [1], [0, 0, 1, 1], [], []>} : vector<40x32xf32>, vector<32x256xf32>, vector<40x256xf32> -> vector<40x256xf32>
    %c0_3 = arith.constant 0 : index
    %c0_4 = arith.constant 0 : index
    %3 = vector.load %arg3[%c0_3, %c0_4] : memref<1x256xf32, #tpu.memory_space<vmem>>, vector<1x256xf32>
    %4 = vector.broadcast %3 : vector<1x256xf32> to vector<40x256xf32>
    %5 = arith.addf %2, %4 : vector<40x256xf32>
    %cst_5 = arith.constant 0.000000e+00 : f32
    %6 = vector.broadcast %cst_5 : f32 to vector<40x256xf32>
    %7 = arith.maximumf %5, %6 : vector<40x256xf32>
    %c0_6 = arith.constant 0 : index
    %c0_7 = arith.constant 0 : index
    %8 = vector.load %arg4[%c0_6, %c0_7] : memref<256x64xf32, #tpu.memory_space<vmem>>, vector<256x64xf32>
    %cst_8 = arith.constant dense<0.000000e+00> : vector<40x64xf32>
    %9 = tpu.matmul %7, %8, %cst_8 {dimension_numbers = #tpu.dot_dimension_numbers<[1], [0], [0], [1], [0, 0, 1, 1], [], []>} : vector<40x256xf32>, vector<256x64xf32>, vector<40x64xf32> -> vector<40x64xf32>
    %c0_9 = arith.constant 0 : index
    %c0_10 = arith.constant 0 : index
    %10 = vector.load %arg5[%c0_9, %c0_10] : memref<1x64xf32, #tpu.memory_space<vmem>>, vector<1x64xf32>
    %11 = vector.broadcast %10 : vector<1x64xf32> to vector<40x64xf32>
    %12 = arith.addf %9, %11 : vector<40x64xf32>
    %cst_11 = arith.constant 0.000000e+00 : f32
    %13 = vector.broadcast %cst_11 : f32 to vector<40x64xf32>
    %14 = arith.maximumf %12, %13 : vector<40x64xf32>
    %c0_12 = arith.constant 0 : index
    %c0_13 = arith.constant 0 : index
    %15 = vector.load %arg6[%c0_12, %c0_13] : memref<64x1xf32, #tpu.memory_space<vmem>>, vector<64x1xf32>
    %cst_14 = arith.constant dense<0.000000e+00> : vector<40x1xf32>
    %16 = tpu.matmul %14, %15, %cst_14 {dimension_numbers = #tpu.dot_dimension_numbers<[1], [0], [0], [1], [0, 0, 1, 1], [], []>} : vector<40x64xf32>, vector<64x1xf32>, vector<40x1xf32> -> vector<40x1xf32>
    %c0_15 = arith.constant 0 : index
    %c0_16 = arith.constant 0 : index
    %17 = vector.load %arg7[%c0_15, %c0_16] : memref<1x1xf32, #tpu.memory_space<vmem>>, vector<1x1xf32>
    %18 = vector.broadcast %17 : vector<1x1xf32> to vector<40x1xf32>
    %19 = arith.addf %16, %18 : vector<40x1xf32>
    %c0_17 = arith.constant 0 : index
    %c0_18 = arith.constant 0 : index
    %20 = vector.load %arg8[%c0_17, %c0_18] : memref<4x40xf32, #tpu.memory_space<vmem>>, vector<4x40xf32>
    %cst_19 = arith.constant dense<0.000000e+00> : vector<4x1xf32>
    %21 = tpu.matmul %20, %19, %cst_19 {dimension_numbers = #tpu.dot_dimension_numbers<[1], [0], [0], [1], [0, 0, 1, 1], [], []>} : vector<4x40xf32>, vector<40x1xf32>, vector<4x1xf32> -> vector<4x1xf32>
    %cst_20 = arith.constant 1.000000e-01 : f32
    %22 = vector.broadcast %cst_20 : f32 to vector<4x1xf32>
    %23 = arith.mulf %21, %22 : vector<4x1xf32>
    %c0_21 = arith.constant 0 : index
    %c0_22 = arith.constant 0 : index
    %24 = vector.load %arg9[%c0_21, %c0_22] : memref<4x1xf32, #tpu.memory_space<vmem>>, vector<4x1xf32>
    tpu.vector_store %arg9[%c0_21, %c0_22], %23 {strides = array<i32>} : memref<4x1xf32, #tpu.memory_space<vmem>>, vector<4x1xf32>,
    return
  }
  func.func @transform_0(%arg0: i32) -> (i32, i32) {
    %c0_i32 = arith.constant 0 : i32
    %c0_i32_0 = arith.constant 0 : i32
    return %arg0, %c0_i32 : i32, i32
  }
  func.func @transform_1(%arg0: i32) -> (i32, i32) {
    %c0_i32 = arith.constant 0 : i32
    %c0_i32_0 = arith.constant 0 : i32
    %c0_i32_1 = arith.constant 0 : i32
    return %c0_i32, %c0_i32_0 : i32, i32
  }
  func.func @transform_2(%arg0: i32) -> (i32, i32) {
    %c0_i32 = arith.constant 0 : i32
    %c0_i32_0 = arith.constant 0 : i32
    %c0_i32_1 = arith.constant 0 : i32
    return %c0_i32, %c0_i32_0 : i32, i32
  }
  func.func @transform_3(%arg0: i32) -> (i32, i32) {
    %c0_i32 = arith.constant 0 : i32
    %c0_i32_0 = arith.constant 0 : i32
    %c0_i32_1 = arith.constant 0 : i32
    return %c0_i32, %c0_i32_0 : i32, i32
  }
  func.func @transform_4(%arg0: i32) -> (i32, i32) {
    %c0_i32 = arith.constant 0 : i32
    %c0_i32_0 = arith.constant 0 : i32
    %c0_i32_1 = arith.constant 0 : i32
    return %c0_i32, %c0_i32_0 : i32, i32
  }
  func.func @transform_5(%arg0: i32) -> (i32, i32) {
    %c0_i32 = arith.constant 0 : i32
    %c0_i32_0 = arith.constant 0 : i32
    %c0_i32_1 = arith.constant 0 : i32
    return %c0_i32, %c0_i32_0 : i32, i32
  }
  func.func @transform_6(%arg0: i32) -> (i32, i32) {
    %c0_i32 = arith.constant 0 : i32
    %c0_i32_0 = arith.constant 0 : i32
    %c0_i32_1 = arith.constant 0 : i32
    return %c0_i32, %c0_i32_0 : i32, i32
  }
  func.func @transform_7(%arg0: i32) -> (i32, i32) {
    %c0_i32 = arith.constant 0 : i32
    %c0_i32_0 = arith.constant 0 : i32
    %c0_i32_1 = arith.constant 0 : i32
    return %c0_i32, %c0_i32_0 : i32, i32
  }
  func.func @transform_8(%arg0: i32) -> (i32, i32) {
    %c0_i32 = arith.constant 0 : i32
    %c0_i32_0 = arith.constant 0 : i32
    return %arg0, %c0_i32 : i32, i32
  }
}

</mosaic_0001>

<bundles_post_ra>
// kernel: regressor_delta_mean.1
= control target key start
LH: loop header
LB: loop body
LE: loop exit
PB: predicated region body
PF: predicated region fallthrough
CT: control target
= control target key end

     0   :  { %vm50_vm0 = vcmask 261120   ;;  %vm257_vm1 = vcmask 523264   ;;  %vm306_vm2 = vcmask 326656   ;;  %vm331_vm3 = vcmask 3072   ;;  %s593_s1 = inlined_call_operand.vmem [shape: f32[32,256], index: 1, kind: input, shape index: {}]   ;;  %s594_s0 = inlined_call_operand.vmem [shape: f32[40,32], index: 0, kind: input, shape index: {}]   ;;  %s595_s3 = inlined_call_operand.vmem [shape: f32[256,64], index: 3, kind: input, shape index: {}]   ;;  %s596_s4 = inlined_call_operand.vmem [shape: f32[1,64], index: 4, kind: input, shape index: {}]   ;;  %s597_s2 = inlined_call_operand.vmem [shape: f32[1,256], index: 2, kind: input, shape index: {}]   ;;  %s598_s5 = inlined_call_operand.vmem [shape: f32[64,1], index: 5, kind: input, shape index: {}]   ;;  %s599_s6 = inlined_call_operand.<no memory space> [shape: f32[1,1], index: 6, kind: input, shape index: {}]   ;;  %s600_s7 = inlined_call_operand.vmem [shape: f32[4,40], index: 7, kind: input, shape index: {}]   ;;  %s601_s8 = inlined_call_operand.vmem [shape: f32[4,1], index: 8, kind: output, shape index: {}]  }
   0x1   :  { %v42_v0 = vld [vmem:[%s593_s1 + $0x30] sm:$0xff]  ;;  %v40_v1 = vld [vmem:[%s593_s1 + $0x20] sm:$0xff]  ;;  %v34_v5 = vld [vmem:[%s594_s0 + $0x18] sm:$0xff] }
   0x2   :  { %78 = vmatpush.msra.mxu0 %v42_v0  ;;  %353 = vmatpush.msra.mxu1 %v42_v0  ;;  %v38_v2 = vld [vmem:[%s593_s1 + $0x10] sm:$0xff]  ;;  %v36_v3 = vld [vmem:[%s593_s1] sm:$0xff]  ;;  %v43_v6 = vld [vmem:[%s593_s1 + $0x38] sm:$0xff] }
   0x3   :  { %v31_v4 = vld [vmem:[%s594_s0] sm:$0xff]  ;;  %v41_v7 = vld [vmem:[%s593_s1 + $0x28] sm:$0xff]  ;;  %v39_v8 = vld [vmem:[%s593_s1 + $0x18] sm:$0xff] }
   0x4   :  { %79 = vmatpush.msra.mxu0 %v40_v1  ;;  %354 = vmatpush.msra.mxu1 %v40_v1  ;;  %v37_v9 = vld [vmem:[%s593_s1 + $0x8] sm:$0xff]  ;;  %v35_v11 = vld [vmem:[%s594_s0 + $0x20] sm:$0xff]  ;;  %v33_v12 = vld [vmem:[%s594_s0 + $0x10] sm:$0xff] }
   0x5   :  { %v32_v10 = vld [vmem:[%s594_s0 + $0x8] sm:$0xff]  ;;  %v155_v13 = vld [vmem:[%s595_s3 + $0x78] sm:$0xff]  ;;  %v154_v14 = vld [vmem:[%s595_s3 + $0x70] sm:$0xff] }
   0x6   :  { %80 = vmatpush.msra.mxu0 %v38_v2  ;;  %355 = vmatpush.msra.mxu1 %v38_v2  ;;  %v153_v15 = vld [vmem:[%s595_s3 + $0x68] sm:$0xff]  ;;  %v171_v16 = vld [vmem:[%s595_s3 + $0xf8] sm:$0xff]  ;;  %v170_v17 = vld [vmem:[%s595_s3 + $0xf0] sm:$0xff] }
   0x7   :  { %176 = vmatpush.msra.mxu2 %v155_v13  ;;  %v152_v18 = vld [vmem:[%s595_s3 + $0x60] sm:$0xff]  ;;  %208 = vmatpush.msra.mxu3 %v171_v16  ;;  %v169_v19 = vld [vmem:[%s595_s3 + $0xe8] sm:$0xff]  ;;  %v151_v20 = vld [vmem:[%s595_s3 + $0x58] sm:$0xff] }
   0x8   :  { %81 = vmatpush.msra.mxu0 %v36_v3  ;;  %356 = vmatpush.msra.mxu1 %v36_v3  ;;  %v168_v21 = vld [vmem:[%s595_s3 + $0xe0] sm:$0xff]  ;;  %v150_v22 = vld [vmem:[%s595_s3 + $0x50] sm:$0xff]  ;;  %v167_v23 = vld [vmem:[%s595_s3 + $0xd8] sm:$0xff] }
   0x9   :  { %337 = vmatmul.msk.f32.vlgmr.msra.gmra.mxu0 %vm50_vm0, %v31_v4  ;;  %340 = vmatmul.msk.f32.vlgmr.msra.gmra.mxu1 %vm50_vm0, %v34_v5  ;;  %v149_v24 = vld [vmem:[%s595_s3 + $0x48] sm:$0xff]  ;;  %v148_v25 = vld [vmem:[%s595_s3 + $0x40] sm:$0xff]  ;;  %v147_v26 = vld [vmem:[%s595_s3 + $0x38] sm:$0xff] }
   0xa   :  { %110 = vmatpush.msrb.mxu1 %v43_v6  ;;  %177 = vmatpush.msra.mxu2 %v154_v14  ;;  %v146_v27 = vld [vmem:[%s595_s3 + $0x30] sm:$0xff]  ;;  %v145_v28 = vld [vmem:[%s595_s3 + $0x28] sm:$0xff]  ;;  %v144_v29 = vld [vmem:[%s595_s3 + $0x20] sm:$0xff] }
   0xb   :  { %209 = vmatpush.msra.mxu3 %v170_v17  ;;  %v143_v30 = vld [vmem:[%s595_s3 + $0x18] sm:$0xff]  ;;  %v142_v31 = vld [vmem:[%s595_s3 + $0x10] sm:$0xff]  ;;  %v141_v33 = vld [vmem:[%s595_s3 + $0x8] sm:$0xff] }
   0xc   :  { %111 = vmatpush.msrb.mxu1 %v41_v7  ;;  %178 = vmatpush.msra.mxu2 %v153_v15  ;;  %v166_v32 = vld [vmem:[%s595_s3 + $0xd0] sm:$0xff]  ;;  %v165_v34 = vld [vmem:[%s595_s3 + $0xc8] sm:$0xff]  ;;  %v140_v35 = vld [vmem:[%s595_s3] sm:$0xff] }
   0xd   :  { %210 = vmatpush.msra.mxu3 %v169_v19  ;;  %v164_v36 = vld [vmem:[%s595_s3 + $0xc0] sm:$0xff]  ;;  %v163_v37 = vld [vmem:[%s595_s3 + $0xb8] sm:$0xff]  ;;  %v162_v38 = vld [vmem:[%s595_s3 + $0xb0] sm:$0xff] }
   0xe   :  { %112 = vmatpush.msrb.mxu1 %v39_v8  ;;  %179 = vmatpush.msra.mxu2 %v152_v18  ;;  %v161_v39 = vld [vmem:[%s595_s3 + $0xa8] sm:$0xff]  ;;  %v160_v40 = vld [vmem:[%s595_s3 + $0xa0] sm:$0xff]  ;;  %v159_v41 = vld [vmem:[%s595_s3 + $0x98] sm:$0xff] }
   0xf   :  { %211 = vmatpush.msra.mxu3 %v168_v21  ;;  %v158_v42 = vld [vmem:[%s595_s3 + $0x90] sm:$0xff]  ;;  %v157_v43 = vld [vmem:[%s595_s3 + $0x88] sm:$0xff]  ;;  %v156_v44 = vld [vmem:[%s595_s3 + $0x80] sm:$0xff] }
  0x10   :  { %113 = vmatpush.msrb.mxu1 %v37_v9  ;;  %180 = vmatpush.msra.mxu2 %v151_v20  ;;  %v44_v45 = vld [vmem:[%s597_s2] sm:$0x3]  ;;  %v252_v14 = vld [vmem:[%s598_s5 + $0x38] sm:$0xff]  ;;  %v251_v15 = vld [vmem:[%s598_s5 + $0x30] sm:$0xff] }
  0x11   :  { %338 = vmatmul.msk.f32.gmra.mxu0 %vm50_vm0, %v32_v10  ;;  %341 = vmatmul.msk.f32.gmra.mxu1 %vm50_vm0, %v35_v11  ;;  %v46_v46 = vperm.slane %v44_v45, 0  ;;  %v47_v55 = vperm.slane %v44_v45, 1  ;;  %v250_v16 = vld [vmem:[%s598_s5 + $0x28] sm:$0xff]  ;;  %v249_v17 = vld [vmem:[%s598_s5 + $0x20] sm:$0xff]  ;;  %v248_v18 = vld [vmem:[%s598_s5 + $0x18] sm:$0xff] }
  0x12   :  { %181 = vmatpush.msra.mxu2 %v150_v22  ;;  %212 = vmatpush.msra.mxu3 %v167_v23  ;;  %v247_v19 = vld [vmem:[%s598_s5 + $0x10] sm:$0xff]  ;;  %v246_v20 = vld [vmem:[%s598_s5 + $0x8] sm:$0xff]  ;;  %v245_v21 = vld [vmem:[%s598_s5] sm:$0xff] }
  0x13   :  { %281 = vmatpush.msrb.mxu0 %v252_v14  ;;  %v357_v23 = vld [vmem:[%s596_s4] ss:$0 sm:$0xff] }
  0x14   :  { %182 = vmatpush.msra.mxu2 %v149_v24  ;;  %213 = vmatpush.msra.mxu3 %v166_v32 }
  0x15   :  { %282 = vmatpush.msrb.mxu0 %v251_v15 }
  0x16   :  { %183 = vmatpush.msra.mxu2 %v148_v25  ;;  %214 = vmatpush.msra.mxu3 %v165_v34 }
  0x17   :  { %283 = vmatpush.msrb.mxu0 %v250_v16 }
  0x18   :  { %184 = vmatpush.msra.mxu2 %v147_v26  ;;  %215 = vmatpush.msra.mxu3 %v164_v36 }
  0x19   :  { %339 = vmatmul.msk.f32.gmra.mxu0 %vm50_vm0, %v33_v12  ;;  %342 = vmatmul.msk.f32.vlgmr.msrb.gmra.mxu1 %vm50_vm0, %v31_v4 }
  0x1a   :  { %185 = vmatpush.msra.mxu2 %v146_v27  ;;  %216 = vmatpush.msra.mxu3 %v163_v37 }
  0x1b   :  { %284 = vmatpush.msrb.mxu0 %v249_v17 }
  0x1c   :  { %186 = vmatpush.msra.mxu2 %v145_v28  ;;  %217 = vmatpush.msra.mxu3 %v162_v38 }
  0x1d   :  { %285 = vmatpush.msrb.mxu0 %v248_v18 }
  0x1e   :  { %187 = vmatpush.msra.mxu2 %v144_v29  ;;  %218 = vmatpush.msra.mxu3 %v161_v39 }
  0x1f   :  { %286 = vmatpush.msrb.mxu0 %v247_v19 }
  0x20   :  { %188 = vmatpush.msra.mxu2 %v143_v30  ;;  %219 = vmatpush.msra.mxu3 %v160_v40  ;;  %v13_v30 = vstv %s599_s6 }
  0x21   :  { %343 = vmatmul.msk.f32.gmra.mxu1 %vm50_vm0, %v32_v10  ;;  %287 = vmatpush.msrb.mxu0 %v246_v20  ;;  %14 = vst [vmem:[#allocation2] sm:$0x1] %v13_v30 }
  0x22   :  { %189 = vmatpush.msra.mxu2 %v142_v31  ;;  %220 = vmatpush.msra.mxu3 %v159_v41 }
  0x23   :  { %288 = vmatpush.msrb.mxu0 %v245_v21 }
  0x24   :  { %190 = vmatpush.msra.mxu2 %v141_v33  ;;  %221 = vmatpush.msra.mxu3 %v158_v42 }
  0x26   :  { %191 = vmatpush.msra.mxu2 %v140_v35  ;;  %222 = vmatpush.msra.mxu3 %v157_v43 }
  0x28   :  { %223 = vmatpush.msra.mxu3 %v156_v44 }
  0x29   :  { %344 = vmatmul.msk.f32.gmra.mxu1 %vm50_vm0, %v33_v12 }
  0x31   :  { %345 = vmatmul.msk.f32.gmra.mxu1 %vm50_vm0, %v34_v5 }
  0x39   :  { %346 = vmatmul.msk.f32.gmra.mxu1 %vm50_vm0, %v35_v11 }
  0x86   :  { %v83_v47 = vpop.f32.mrf.mxu0  ;;  %v92_v48 = vpop.f32.mrf.mxu1 }
  0x87   :  { %v84_v49 = vadd.f32 %v83_v47, %v46_v46  ;;  %v93_v62 = vadd.f32 %v92_v48, %v46_v46 }
  0x89   :  { %v130_v50 = vmax.f32 %v84_v49, 0.0  ;;  %v136_v1 = vmax.f32 %v93_v62, 0.0 }
  0x8b   :  { %192 = vmatmul.f32.vlgmr.msra.gmra.mxu2 %v130_v50 }
  0x8e   :  { %v86_v51 = vpop.f32.mrf.mxu0  ;;  %v95_v52 = vpop.f32.mrf.mxu1 }
  0x8f   :  { %v87_v53 = vadd.f32 %v86_v51, %v46_v46  ;;  %v96_v3 = vadd.f32 %v95_v52, %v46_v46 }
  0x91   :  { %v132_v54 = vmax.f32 %v87_v53, 0.0  ;;  %v138_v6 = vmax.f32 %v96_v3, 0.0  ;;  %v358_v53 = vld [vmem:[#allocation2] ss:$0 sm:$0xff] }
  0x93   :  { %195 = vmatmul.f32.gmra.mxu2 %v132_v54 }
  0x96   :  { %v89_v56 = vpop.f32.mrf.mxu0  ;;  %v115_v57 = vpop.f32.mrf.mxu1 }
  0x97   :  { %v90_v58 = vadd.f32 %v89_v56, %v46_v46  ;;  %v116_v59 = vadd.f32 %v115_v57, %v47_v55 }
  0x99   :  { %v134_v60 = vmax.f32 %v90_v58, 0.0  ;;  %v131_v61 = vmax.f32 %v116_v59, 0.0 }
  0x9b   :  { %198 = vmatmul.f32.gmra.mxu2 %v134_v60  ;;  %224 = vmatmul.f32.vlgmr.msra.gmra.mxu3 %v131_v61  ;;  %v305_v60 = vld [vmem:[%s600_s7] sm:$0xf] }
  0x9e   :  { %v118_v63 = vpop.f32.mrf.mxu1 }
  0x9f   :  { %v119_v0 = vadd.f32 %v118_v63, %v47_v55 }
  0xa1   :  { %v133_v2 = vmax.f32 %v119_v0, 0.0 }
  0xa3   :  { %201 = vmatmul.f32.gmra.mxu2 %v136_v1  ;;  %227 = vmatmul.f32.gmra.mxu3 %v133_v2 }
  0xa6   :  { %v121_v4 = vpop.f32.mrf.mxu1 }
  0xa7   :  { %v122_v5 = vadd.f32 %v121_v4, %v47_v55 }
  0xa9   :  { %v135_v7 = vmax.f32 %v122_v5, 0.0 }
  0xab   :  { %204 = vmatmul.f32.gmra.mxu2 %v138_v6  ;;  %230 = vmatmul.f32.gmra.mxu3 %v135_v7 }
  0xae   :  { %v124_v8 = vpop.f32.mrf.mxu1 }
  0xaf   :  { %v125_v9 = vadd.f32 %v124_v8, %v47_v55 }
  0xb1   :  { %v137_v10 = vmax.f32 %v125_v9, 0.0 }
  0xb3   :  { %233 = vmatmul.f32.gmra.mxu3 %v137_v10 }
  0xb6   :  { %v127_v11 = vpop.f32.mrf.mxu1 }
  0xb7   :  { %v128_v12 = vadd.f32 %v127_v11, %v47_v55 }
  0xb9   :  { %v139_v13 = vmax.f32 %v128_v12, 0.0 }
  0xbb   :  { %236 = vmatmul.f32.gmra.mxu3 %v139_v13 }
 0x10e   :  { %v193_v22 = vpop.f32.mrf.mxu2 }
 0x10f   :  { %v194_v24 = vadd.f32 %v357_v23, %v193_v22 }
 0x116   :  { %v196_v25 = vpop.f32.mrf.mxu2 }
 0x117   :  { %v197_v29 = vadd.f32 %v357_v23, %v196_v25 }
 0x11e   :  { %v225_v26 = vpop.f32.mrf.mxu3  ;;  %v199_v31 = vpop.f32.mrf.mxu2 }
 0x11f   :  { %v226_v27 = vadd.f32 %v225_v26, %v194_v24  ;;  %v200_v35 = vadd.f32 %v357_v23, %v199_v31 }
 0x121   :  { %v240_v28 = vmax.f32 %v226_v27, 0.0 }
 0x123   :  { %347 = vmatmul.msk.f32.vlgmr.msrb.gmra.mxu0 %vm257_vm1, %v240_v28 }
 0x126   :  { %v228_v32 = vpop.f32.mrf.mxu3  ;;  %v202_v38 = vpop.f32.mrf.mxu2 }
 0x127   :  { %v229_v33 = vadd.f32 %v228_v32, %v197_v29  ;;  %v203_v40 = vadd.f32 %v357_v23, %v202_v38 }
 0x129   :  { %v241_v34 = vmax.f32 %v229_v33, 0.0 }
 0x12b   :  { %348 = vmatmul.msk.f32.gmra.mxu0 %vm257_vm1, %v241_v34 }
 0x12e   :  { %v231_v36 = vpop.f32.mrf.mxu3  ;;  %v205_v44 = vpop.f32.mrf.mxu2 }
 0x12f   :  { %v232_v37 = vadd.f32 %v231_v36, %v200_v35  ;;  %v206_v45 = vadd.f32 %v357_v23, %v205_v44 }
 0x131   :  { %v242_v39 = vmax.f32 %v232_v37, 0.0 }
 0x133   :  { %349 = vmatmul.msk.f32.gmra.mxu0 %vm257_vm1, %v242_v39 }
 0x136   :  { %v234_v41 = vpop.f32.mrf.mxu3 }
 0x137   :  { %v235_v42 = vadd.f32 %v234_v41, %v203_v40 }
 0x139   :  { %v243_v43 = vmax.f32 %v235_v42, 0.0 }
 0x13b   :  { %350 = vmatmul.msk.f32.gmra.mxu0 %vm257_vm1, %v243_v43 }
 0x13e   :  { %v237_v46 = vpop.f32.mrf.mxu3 }
 0x13f   :  { %v238_v47 = vadd.f32 %v237_v46, %v206_v45 }
 0x141   :  { %v244_v48 = vmax.f32 %v238_v47, 0.0 }
 0x143   :  { %351 = vmatmul.msk.f32.gmra.mxu0 %vm257_vm1, %v244_v48 }
 0x1a0   :  { %v290_v49 = vpop.f32.mrf.mxu0 }
 0x1a1   :  { %v291_v59 = vadd.f32 %v358_v53, %v290_v49 }
 0x1a8   :  { %v293_v50 = vpop.f32.mrf.mxu0 }
 0x1a9   :  { %v294_v58 = vadd.f32 %v358_v53, %v293_v50 }
 0x1b0   :  { %v296_v51 = vpop.f32.mrf.mxu0 }
 0x1b1   :  { %v297_v57 = vadd.f32 %v358_v53, %v296_v51 }
 0x1b8   :  { %v299_v52 = vpop.f32.mrf.mxu0 }
 0x1b9   :  { %v300_v56 = vadd.f32 %v358_v53, %v299_v52 }
 0x1c0   :  { %v302_v54 = vpop.f32.mrf.mxu0 }
 0x1c1   :  { %v303_v55 = vadd.f32 %v358_v53, %v302_v54 }
 0x1c3   :  { %321 = vmatpush.msra.mxu1 %v303_v55 }
 0x1c5   :  { %322 = vmatpush.msra.mxu1 %v300_v56 }
 0x1c7   :  { %323 = vmatpush.msra.mxu1 %v297_v57 }
 0x1c9   :  { %324 = vmatpush.msra.mxu1 %v294_v58 }
 0x1cb   :  { %325 = vmatpush.msra.mxu1 %v291_v59 }
 0x1cc   :  { %352 = vmatmul.msk.f32.vlgmr.msra.gmra.mxu1 %vm306_vm2, %v305_v60 }
 0x249   :  { %v327_v61 = vpop.f32.mrf.mxu1 }
 0x24a   :  { %v330_v62 = vmul.f32 0.1, %v327_v61 }
 0x24c   :  { %332 = vst.msk [vmem:[%s601_s8] sm:$0xf] %vm331_vm3, %v330_v62 }

</bundles_post_ra>
